<compile_context>
chip_gen: v6e
topology: v6e:2x2x1
jax: 0.10.0
libtpu: 0.0.40
codegen_flags: <defaults>
</compile_context>

<pallas_src>
import functools

import jax
import jax.numpy as jnp
from jax.experimental import pallas as pl
from jax.experimental.pallas import tpu as pltpu


def _round_up(x, m):
    return (x + m - 1) // m * m


def _cdiv(a, b):
    return (a + b - 1) // b


# ---------------------------------------------------------------------------
# Kernel 1: conv-as-matmul with f32 VMEM accumulation (+ optional BN partials).
# Grid = (M tiles, OC tiles, K tiles); K is the trailing "arbitrary" reduction
# axis; M / OC axes are "parallel" (megacore / v7x two-TC sharding).
# ---------------------------------------------------------------------------
def _conv_kernel(a_ref, b_ref, *rest, b_resident, tk, with_stats):
    if with_stats:
        y_ref, stats_ref, acc_ref = rest
    else:
        y_ref, acc_ref = rest
        stats_ref = None

    k = pl.program_id(2)

    @pl.when(k == 0)
    def _():
        acc_ref[...] = jnp.zeros_like(acc_ref)

    if b_resident:
        # B holds the full (Kp, tn) strip in VMEM (DMA'd once, not per M tile);
        # slice the current tk chunk here.
        start = pl.multiple_of(k * tk, tk)
        b = b_ref[pl.ds(start, tk), :]
    else:
        b = b_ref[...]

    acc_ref[...] += jnp.dot(a_ref[...], b, preferred_element_type=jnp.float32)

    @pl.when(k == pl.num_programs(2) - 1)
    def _():
        y = acc_ref[...]                       # (tm, tn) f32
        y_ref[...] = y.astype(y_ref.dtype)     # bf16 conv output
        if with_stats:
            # Per-tile partial sums for BN batch stats.  Padded rows/channels
            # of A/B are exactly zero, so no masking is needed; the wrapper
            # divides by the true element count.  Row 0 = sum, row 1 = sumsq.
            s = jnp.sum(y, axis=0, keepdims=True)        # (1, tn)
            q = jnp.sum(y * y, axis=0, keepdims=True)    # (1, tn)
            row = jax.lax.broadcasted_iota(jnp.int32, (2, y.shape[1]), 0)
            stats_ref[...] = jnp.where(row == 0, s, q)[None]   # (1, 2, tn)


# ---------------------------------------------------------------------------
# Kernel 2: fused per-channel affine (folded BN) + ReLU + NHWC->NCHW transpose
# + f32 cast.  One image slab per grid step; the stored last dim is an OH*OW
# slab (lane-dense), never W.
# ---------------------------------------------------------------------------
def _bn_relu_t_kernel(y_ref, scale_ref, shift_ref, o_ref, *, relu, oc):
    z = y_ref[...].astype(jnp.float32) * scale_ref[...] + shift_ref[...]
    if relu:
        z = jnp.maximum(z, 0.0)
    o_ref[...] = z.T[:oc][None]                # (1, OC, ts)


def basic_conv_forward(x, weight, gamma, beta, *, stride=1, padding=0,
                       dilation=1, relu=True, bn=True, eps=1e-5):
    """Forward of BasicConv (groups=1, bias=False).  x is NCHW (PyTorch)."""
    # TODO(synk): groups > 1 (grouped conv) not implemented.
    N, C, H, W = x.shape
    OC, Cw, KH, KW = weight.shape
    assert C == Cw, "groups != 1 not supported"
    OH = (H + 2 * padding - dilation * (KH - 1) - 1) // stride + 1
    OW = (W + 2 * padding - dilation * (KW - 1) - 1) // stride + 1
    OHW = OH * OW
    K = C * KH * KW

    # ---- glue: bf16 NHWC tap-gather (im2col), single expanded write ----
    # TODO(synk): move this tap gather into kernel 1 to avoid materializing A.
    x_nhwc = x.astype(jnp.bfloat16).transpose(0, 2, 3, 1)       # (N,H,W,C)
    xp = jnp.pad(x_nhwc, ((0, 0), (padding, padding), (padding, padding), (0, 0)))
    taps = []
    for i in range(KH):
        for j in range(KW):
            di, dj = i * dilation, j * dilation
            taps.append(xp[:, di:di + (OH - 1) * stride + 1:stride,
                              dj:dj + (OW - 1) * stride + 1:stride, :])
    A = jnp.concatenate(taps, axis=-1).reshape(N, OHW, K)       # bf16
    OHWp = _round_up(OHW, 8)               # per-image rows sublane-aligned
    if OHWp != OHW:
        A = jnp.pad(A, ((0, 0), (0, OHWp - OHW), (0, 0)))
    M_rows = N * OHWp
    A = A.reshape(M_rows, K)

    # Weights in tap-major / channel-minor row order to match the concat above.
    B = weight.astype(jnp.bfloat16).transpose(2, 3, 1, 0).reshape(K, OC)

    # ---- tile selection ----
    OCp = _round_up(OC, 128)
    Kp = _round_up(K, 128)
    tn = OCp if OCp <= 512 else (256 if OCp % 256 == 0 else 128)
    grid_n = OCp // tn
    tk = Kp if Kp <= 1024 else (512 if Kp % 512 == 0 else
                                (256 if Kp % 256 == 0 else 128))
    tm = 512
    if M_rows <= tm:
        tm = _round_up(M_rows, 8)
    if (_cdiv(M_rows, tm) * grid_n) < 2 and M_rows > 8:
        # v7x shards the "parallel" axes over two TensorCores; keep >=2 tiles.
        tm = _round_up(_cdiv(M_rows, 2), 8)
    Mp = _round_up(M_rows, tm)
    grid_m, grid_k = Mp // tm, Kp // tk

    A = jnp.pad(A, ((0, Mp - M_rows), (0, Kp - K)))
    B = jnp.pad(B, ((0, Kp - K), (0, OCp - OC)))

    # Keep B fully VMEM-resident (one DMA total when grid_n == 1) when small.
    b_resident = Kp * tn * 2 <= 4 * 1024 * 1024
    if b_resident:
        b_spec = pl.BlockSpec((Kp, tn), lambda i, j, k: (0, j))
    else:
        b_spec = pl.BlockSpec((tk, tn), lambda i, j, k: (k, j))

    out_shapes = [jax.ShapeDtypeStruct((Mp, OCp), jnp.bfloat16)]
    out_specs = [pl.BlockSpec((tm, tn), lambda i, j, k: (i, j))]
    if bn:
        out_shapes.append(jax.ShapeDtypeStruct((grid_m, 2, OCp), jnp.float32))
        out_specs.append(pl.BlockSpec((1, 2, tn), lambda i, j, k: (i, 0, j)))

    kern1 = functools.partial(_conv_kernel, b_resident=b_resident, tk=tk,
                              with_stats=bn)
    res = pl.pallas_call(
        kern1,
        out_shape=tuple(out_shapes),
        grid_spec=pltpu.PrefetchScalarGridSpec(
            num_scalar_prefetch=0,
            grid=(grid_m, grid_n, grid_k),
            in_specs=[pl.BlockSpec((tm, tk), lambda i, j, k: (i, k)), b_spec],
            out_specs=out_specs,
            scratch_shapes=[pltpu.VMEM((tm, tn), jnp.float32)]),
        compiler_params=pltpu.CompilerParams(
            dimension_semantics=("parallel", "parallel", "arbitrary"),
            vmem_limit_bytes=48 * 1024 * 1024),
    )(A, B)
    if bn:
        y, stats = res
    else:
        y = res[0]
        stats = None

    # ---- fold BN (training-mode batch stats, biased variance) ----
    if bn:
        cnt = float(N * OHW)
        csum = jnp.sum(stats[:, 0, :], axis=0)           # (OCp,)
        cssq = jnp.sum(stats[:, 1, :], axis=0)           # (OCp,)
        mean = csum / cnt
        # E[x^2]-E[x]^2 in f32; clamp guards tiny negatives.
        # TODO(synk): shifted two-pass variance if activations are far from
        # zero mean at very large M (catastrophic-cancellation risk).
        var = jnp.maximum(cssq / cnt - mean * mean, 0.0)
        gamma_p = jnp.pad(gamma.astype(jnp.float32), (0, OCp - OC))
        beta_p = jnp.pad(beta.astype(jnp.float32), (0, OCp - OC))
        inv_std = gamma_p * jax.lax.rsqrt(var + eps)
        scale = inv_std[None, :]
        shift = (beta_p - mean * inv_std)[None, :]
    else:
        scale = jnp.ones((1, OCp), jnp.float32)
        shift = jnp.zeros((1, OCp), jnp.float32)

    # ---- kernel 2: BN affine + ReLU + NHWC->NCHW transpose, f32 out ----
    ts = OHWp
    budget = 16 * 1024 * 1024
    if OHWp * OCp * 12 > budget:
        ts = 0
        for cand in range(OHWp - OHWp % 128, 0, -128):
            if OHWp % cand == 0 and cand * OCp * 12 <= budget:
                ts = cand
                break
        if ts == 0:
            ts = OHWp   # TODO(synk): no 128-multiple divisor of OH*OW; big tile
    steps = OHWp // ts

    kern2 = functools.partial(_bn_relu_t_kernel, relu=relu, oc=OC)
    out = pl.pallas_call(
        kern2,
        out_shape=jax.ShapeDtypeStruct((N, OC, OHWp), jnp.float32),
        grid_spec=pltpu.PrefetchScalarGridSpec(
            num_scalar_prefetch=0,
            grid=(N, steps),
            in_specs=[pl.BlockSpec((ts, OCp), lambda n, s: (n * steps + s, 0)),
                      pl.BlockSpec((1, OCp), lambda n, s: (0, 0)),
                      pl.BlockSpec((1, OCp), lambda n, s: (0, 0))],
            out_specs=pl.BlockSpec((1, OC, ts), lambda n, s: (n, 0, s))),
        compiler_params=pltpu.CompilerParams(
            dimension_semantics=("parallel", "parallel"),
            vmem_limit_bytes=48 * 1024 * 1024),
    )(y, scale, shift)

    if OHWp != OHW:
        out = out[:, :, :OHW]
    return out.reshape(N, OC, OH, OW)


def _reference(x, weight, gamma, beta, *, stride, padding, dilation, eps=1e-5):
    y = jax.lax.conv_general_dilated(
        x, weight, window_strides=(stride, stride),
        padding=[(padding, padding), (padding, padding)],
        rhs_dilation=(dilation, dilation),
        dimension_numbers=("NCHW", "OIHW", "NCHW"))
    mean = y.mean(axis=(0, 2, 3), keepdims=True)
    var = jnp.mean((y - mean) ** 2, axis=(0, 2, 3), keepdims=True)  # biased (BN train)
    yn = (y - mean) / jnp.sqrt(var + eps)
    yn = yn * gamma[None, :, None, None] + beta[None, :, None, None]
    return jnp.maximum(yn, 0.0)


if __name__ == "__main__":
    # BasicConv(in_planes=4, out_planes=8, kernel_size=3, stride=1, padding=1)
    N, C_in, H, W = 2, 4, 16, 16
    C_out, KH, KW = 8, 3, 3
    stride, padding, dilation = 1, 1, 1

    key = jax.random.PRNGKey(0)
    kx, kw = jax.random.split(key)
    x = jax.random.normal(kx, (N, C_in, H, W), dtype=jnp.float32)
    weight = 0.1 * jax.random.normal(kw, (C_out, C_in, KH, KW), dtype=jnp.float32)
    gamma = jnp.ones((C_out,), jnp.float32)   # BatchNorm2d affine init
    beta = jnp.zeros((C_out,), jnp.float32)

    fwd = jax.jit(functools.partial(
        basic_conv_forward, stride=stride, padding=padding, dilation=dilation,
        relu=True, bn=True))
    out = jax.block_until_ready(fwd(x, weight, gamma, beta))

    ref = _reference(x, weight, gamma, beta,
                     stride=stride, padding=padding, dilation=dilation)
    assert out.shape == ref.shape == (N, C_out, H, W)
    # Tolerance accounts for bf16 MXU inputs + bf16 intermediate storage vs. a
    # pure-f32 reference (f32 accumulation / BN stats in both).
    assert jnp.allclose(out, ref, rtol=3e-2, atol=3e-2), "mismatch vs reference"

    print("KERNEL_OK")
</pallas_src>

<mosaic_0001>
module attributes {stable_mosaic.version = 11 : i64} {
  func.func @_conv_kernel(%arg0: i32, %arg1: i32, %arg2: i32, %arg3: memref<256x128xbf16, #tpu.memory_space<vmem>>, %arg4: memref<128x128xbf16, #tpu.memory_space<vmem>>, %arg5: memref<256x128xbf16, #tpu.memory_space<vmem>>, %arg6: memref<1x2x128xf32, #tpu.memory_space<vmem>>, %arg7: memref<256x128xf32, #tpu.memory_space<vmem>>) attributes {dimension_semantics = [#tpu.dimension_semantics<parallel>, #tpu.dimension_semantics<parallel>, #tpu.dimension_semantics<arbitrary>], iteration_bounds = array<i64: 2, 1, 1>, scalar_prefetch = 0 : i64, scratch_operands = 1 : i64, tpu.core_type = #tpu.core_type<tc>, window_params = [{transform_indices = @transform_0, window_bounds = array<i64: 256, 128>}, {transform_indices = @transform_1, window_bounds = array<i64: 128, 128>}, {transform_indices = @transform_2, window_bounds = array<i64: 256, 128>}, {transform_indices = @transform_3, window_bounds = array<i64: 1, 2, 128>}]} {
    %c0_i32 = arith.constant 0 : i32
    %0 = arith.cmpi eq, %arg2, %c0_i32 : i32
    %1 = arith.extui %0 : i1 to i32
    %c0_i32_0 = arith.constant 0 : i32
    %2 = arith.cmpi ne, %1, %c0_i32_0 : i32
    scf.if %2 {
      %cst_9 = arith.constant 0.000000e+00 : f32
      %15 = vector.broadcast %cst_9 : f32 to vector<256x128xf32>
      %c0_10 = arith.constant 0 : index
      %c0_11 = arith.constant 0 : index
      %16 = vector.load %arg7[%c0_10, %c0_11] : memref<256x128xf32, #tpu.memory_space<vmem>>, vector<256x128xf32>
      tpu.vector_store %arg7[%c0_10, %c0_11], %15 {strides = array<i32>} : memref<256x128xf32, #tpu.memory_space<vmem>>, vector<256x128xf32>,
    } else {
    }
    %c128_i32 = arith.constant 128 : i32
    %3 = arith.muli %arg2, %c128_i32 : i32
    %4 = tpu.assume_multiple %3, 128 : i32
    %5 = arith.index_cast %4 : i32 to index
    %c0 = arith.constant 0 : index
    %6 = vector.load %arg4[%5, %c0] : memref<128x128xbf16, #tpu.memory_space<vmem>>, vector<128x128xbf16>
    %c0_1 = arith.constant 0 : index
    %c0_2 = arith.constant 0 : index
    %7 = vector.load %arg7[%c0_1, %c0_2] : memref<256x128xf32, #tpu.memory_space<vmem>>, vector<256x128xf32>
    %c0_3 = arith.constant 0 : index
    %c0_4 = arith.constant 0 : index
    %8 = vector.load %arg3[%c0_3, %c0_4] : memref<256x128xbf16, #tpu.memory_space<vmem>>, vector<256x128xbf16>
    %cst = arith.constant dense<0.000000e+00> : vector<256x128xf32>
    %9 = tpu.matmul %8, %6, %cst {dimension_numbers = #tpu.dot_dimension_numbers<[1], [0], [0], [1], [0, 0, 1, 1], [], []>} : vector<256x128xbf16>, vector<128x128xbf16>, vector<256x128xf32> -> vector<256x128xf32>
    %10 = arith.addf %7, %9 : vector<256x128xf32>
    %c0_5 = arith.constant 0 : index
    %c0_6 = arith.constant 0 : index
    %11 = vector.load %arg7[%c0_5, %c0_6] : memref<256x128xf32, #tpu.memory_space<vmem>>, vector<256x128xf32>
    tpu.vector_store %arg7[%c0_5, %c0_6], %10 {strides = array<i32>} : memref<256x128xf32, #tpu.memory_space<vmem>>, vector<256x128xf32>,
    %c0_i32_7 = arith.constant 0 : i32
    %12 = arith.cmpi eq, %arg2, %c0_i32_7 : i32
    %13 = arith.extui %12 : i1 to i32
    %c0_i32_8 = arith.constant 0 : i32
    %14 = arith.cmpi ne, %13, %c0_i32_8 : i32
    scf.if %14 {
      %c0_9 = arith.constant 0 : index
      %c0_10 = arith.constant 0 : index
      %15 = vector.load %arg7[%c0_9, %c0_10] : memref<256x128xf32, #tpu.memory_space<vmem>>, vector<256x128xf32>
      %16 = arith.truncf %15 : vector<256x128xf32> to vector<256x128xbf16>
      %c0_11 = arith.constant 0 : index
      %c0_12 = arith.constant 0 : index
      %17 = vector.load %arg5[%c0_11, %c0_12] : memref<256x128xbf16, #tpu.memory_space<vmem>>, vector<256x128xbf16>
      tpu.vector_store %arg5[%c0_11, %c0_12], %16 {strides = array<i32>} : memref<256x128xbf16, #tpu.memory_space<vmem>>, vector<256x128xbf16>,
      %cst_13 = arith.constant dense<0.000000e+00> : vector<128xf32>
      %18 = vector.multi_reduction <add>, %15, %cst_13 [0] : vector<256x128xf32> to vector<128xf32>
      %19 = vector.shape_cast %18 : vector<128xf32> to vector<1x128xf32>
      %20 = arith.mulf %15, %15 : vector<256x128xf32>
      %cst_14 = arith.constant dense<0.000000e+00> : vector<128xf32>
      %21 = vector.multi_reduction <add>, %20, %cst_14 [0] : vector<256x128xf32> to vector<128xf32>
      %22 = vector.shape_cast %21 : vector<128xf32> to vector<1x128xf32>
      %23 = tpu.iota {dimensions = array<i32: 0>} : vector<2x128xi32>
      %c0_i32_15 = arith.constant 0 : i32
      %24 = vector.broadcast %c0_i32_15 : i32 to vector<2x128xi32>
      %25 = arith.cmpi eq, %23, %24 : vector<2x128xi32>
      %26 = vector.shape_cast %19 : vector<1x128xf32> to vector<1x128xf32>
      %27 = vector.broadcast %26 : vector<1x128xf32> to vector<2x128xf32>
      %28 = vector.shape_cast %22 : vector<1x128xf32> to vector<1x128xf32>
      %29 = vector.broadcast %28 : vector<1x128xf32> to vector<2x128xf32>
      %30 = arith.select %25, %27, %29 : vector<2x128xi1>, vector<2x128xf32>
      %31 = vector.shape_cast %30 : vector<2x128xf32> to vector<1x2x128xf32>
      %c0_16 = arith.constant 0 : index
      %c0_17 = arith.constant 0 : index
      %c0_18 = arith.constant 0 : index
      %32 = vector.load %arg6[%c0_16, %c0_17, %c0_18] : memref<1x2x128xf32, #tpu.memory_space<vmem>>, vector<1x2x128xf32>
      tpu.vector_store %arg6[%c0_16, %c0_17, %c0_18], %31 {strides = array<i32>} : memref<1x2x128xf32, #tpu.memory_space<vmem>>, vector<1x2x128xf32>,
    } else {
    }
    return
  }
  func.func @transform_0(%arg0: i32, %arg1: i32, %arg2: i32) -> (i32, i32) {
    %c0_i32 = arith.constant 0 : i32
    return %arg0, %arg2 : i32, i32
  }
  func.func @transform_1(%arg0: i32, %arg1: i32, %arg2: i32) -> (i32, i32) {
    %c0_i32 = arith.constant 0 : i32
    %c0_i32_0 = arith.constant 0 : i32
    return %c0_i32, %arg1 : i32, i32
  }
  func.func @transform_2(%arg0: i32, %arg1: i32, %arg2: i32) -> (i32, i32) {
    %c0_i32 = arith.constant 0 : i32
    return %arg0, %arg1 : i32, i32
  }
  func.func @transform_3(%arg0: i32, %arg1: i32, %arg2: i32) -> (i32, i32, i32) {
    %c0_i32 = arith.constant 0 : i32
    %c0_i32_0 = arith.constant 0 : i32
    return %arg0, %c0_i32, %arg1 : i32, i32, i32
  }
}

module attributes {stable_mosaic.version = 11 : i64} {
  func.func @_bn_relu_t_kernel(%arg0: i32, %arg1: i32, %arg2: memref<256x128xbf16, #tpu.memory_space<vmem>>, %arg3: memref<1x128xf32, #tpu.memory_space<vmem>>, %arg4: memref<1x128xf32, #tpu.memory_space<vmem>>, %arg5: memref<1x8x256xf32, #tpu.memory_space<vmem>>) attributes {dimension_semantics = [#tpu.dimension_semantics<parallel>, #tpu.dimension_semantics<parallel>], iteration_bounds = array<i64: 2, 1>, scalar_prefetch = 0 : i64, scratch_operands = 0 : i64, tpu.core_type = #tpu.core_type<tc>, window_params = [{transform_indices = @transform_0, window_bounds = array<i64: 256, 128>}, {pipeline_mode = #tpu.pipeline_mode<synchronous>, transform_indices = @transform_1, window_bounds = array<i64: 1, 128>}, {pipeline_mode = #tpu.pipeline_mode<synchronous>, transform_indices = @transform_2, window_bounds = array<i64: 1, 128>}, {transform_indices = @transform_3, window_bounds = array<i64: 1, 8, 256>}]} {
    %c0 = arith.constant 0 : index
    %c0_0 = arith.constant 0 : index
    %0 = vector.load %arg2[%c0, %c0_0] : memref<256x128xbf16, #tpu.memory_space<vmem>>, vector<256x128xbf16>
    %1 = arith.extf %0 : vector<256x128xbf16> to vector<256x128xf32>
    %c0_1 = arith.constant 0 : index
    %c0_2 = arith.constant 0 : index
    %2 = vector.load %arg3[%c0_1, %c0_2] : memref<1x128xf32, #tpu.memory_space<vmem>>, vector<1x128xf32>
    %3 = vector.broadcast %2 : vector<1x128xf32> to vector<256x128xf32>
    %4 = arith.mulf %1, %3 : vector<256x128xf32>
    %c0_3 = arith.constant 0 : index
    %c0_4 = arith.constant 0 : index
    %5 = vector.load %arg4[%c0_3, %c0_4] : memref<1x128xf32, #tpu.memory_space<vmem>>, vector<1x128xf32>
    %6 = vector.broadcast %5 : vector<1x128xf32> to vector<256x128xf32>
    %7 = arith.addf %4, %6 : vector<256x128xf32>
    %cst = arith.constant 0.000000e+00 : f32
    %8 = vector.broadcast %cst : f32 to vector<256x128xf32>
    %9 = arith.maximumf %7, %8 : vector<256x128xf32>
    %10 = tpu.transpose %9, [1, 0] : vector<256x128xf32> -> vector<128x256xf32>
    %11 = vector.extract_strided_slice %10 {offsets = [0, 0], sizes = [8, 256], strides = [1, 1]} : vector<128x256xf32> to vector<8x256xf32>
    %12 = vector.shape_cast %11 : vector<8x256xf32> to vector<1x8x256xf32>
    %c0_5 = arith.constant 0 : index
    %c0_6 = arith.constant 0 : index
    %c0_7 = arith.constant 0 : index
    %13 = vector.load %arg5[%c0_5, %c0_6, %c0_7] : memref<1x8x256xf32, #tpu.memory_space<vmem>>, vector<1x8x256xf32>
    tpu.vector_store %arg5[%c0_5, %c0_6, %c0_7], %12 {strides = array<i32>} : memref<1x8x256xf32, #tpu.memory_space<vmem>>, vector<1x8x256xf32>,
    return
  }
  func.func @transform_0(%arg0: i32, %arg1: i32) -> (i32, i32) {
    %c1_i32 = arith.constant 1 : i32
    %0 = arith.muli %arg0, %c1_i32 : i32
    %1 = arith.addi %0, %arg1 : i32
    %c0_i32 = arith.constant 0 : i32
    %c0_i32_0 = arith.constant 0 : i32
    return %1, %c0_i32 : i32, i32
  }
  func.func @transform_1(%arg0: i32, %arg1: i32) -> (i32, i32) {
    %c0_i32 = arith.constant 0 : i32
    %c0_i32_0 = arith.constant 0 : i32
    %c0_i32_1 = arith.constant 0 : i32
    return %c0_i32, %c0_i32_0 : i32, i32
  }
  func.func @transform_2(%arg0: i32, %arg1: i32) -> (i32, i32) {
    %c0_i32 = arith.constant 0 : i32
    %c0_i32_0 = arith.constant 0 : i32
    %c0_i32_1 = arith.constant 0 : i32
    return %c0_i32, %c0_i32_0 : i32, i32
  }
  func.func @transform_3(%arg0: i32, %arg1: i32) -> (i32, i32, i32) {
    %c0_i32 = arith.constant 0 : i32
    %c0_i32_0 = arith.constant 0 : i32
    return %arg0, %c0_i32, %arg1 : i32, i32, i32
  }
}

</mosaic_0001>

<bundles_post_ra>
// kernel: basic_conv_forward.3
= control target key start
LH: loop header
LB: loop body
LE: loop exit
PB: predicated region body
PF: predicated region fallthrough
CT: control target
= control target key end

     0   :  { %s685_s12 = smov 0   ;;  %s687_s13 = smov 0   ;;  %s815_s0 = inlined_call_operand.vmem [shape: bf16[512,128], index: 0, kind: input, shape index: {}]   ;;  %s816_s1 = inlined_call_operand.vmem [shape: f32[1,128], index: 1, kind: input, shape index: {}]   ;;  %s817_s2 = inlined_call_operand.vmem [shape: f32[1,128], index: 2, kind: input, shape index: {}]   ;;  %s818_s3 = inlined_call_operand.vmem [shape: f32[2,8,256], index: 3, kind: output, shape index: {}]  }
   0x1   :  { %s689_s14 = smov 0  }
   0x2 LB: > { %s25_s15 = sadd.s32 1, %s659_s13  ;;  %p528_p0 = scmp.ge.s32.totalorder %s663_s14, 1  ;;  %s663_s14 = sphi %s689_s14, %s13_s14   ;;  %s659_s13 = sphi %s687_s13, %s820_s13   ;;  %s655_s12 = sphi %s685_s12, %s819_s12  }
   0x3   : > { %p27_p1 = scmp.ge.s32.totalorder %s25_s15, 2  ;;  %p156_p2 = scmp.lt.s32.totalorder %s663_s14, 3 }
   0x5   : > { %s822_s15 = smov (%p27_p1, %s25_s15), 0  ;;  %p157_p3 = pnand %p528_p0, %p156_p2 }
   0x6   : > { %s529_s16 = sshll.u32 (!%p157_p3), %s655_s12, 5  ;;  %p194_p5 = scmp.lt.s32.totalorder (!%p157_p3), %s655_s12, 1 }
   0x7   : > { %160 = sbr.rel (%p157_p3) target bundleno = 151 (0x97), region = 32  ;;  %p187_p4 = scmp.lt.s32.totalorder (!%p157_p3), %s529_s16, 63 }
   0xc   : > { %s824_s16 = smov (!%p187_p4, %s529_s16), 63  ;;  %v714_v0 = vld [vmem:[%s816_s1] ss:$0 sm:$0xff]  ;;  %s826_s12 = smov (!%p194_p5, %s655_s12), 1 }
   0xd   : > { %s530_s17 = sshll.u32 %s824_s16, 2  ;;  %v723_v9 = vld [vmem:[%s817_s2] ss:$0 sm:$0xff]  ;;  %s537_s25 = sshll.u32 %s826_s12, 4 }
   0xe   : > { %s709_s20 = scalar_lea.vmem %s815_s0, %s530_s17  ;;  %s201_s28 = scalar_lea.vmem %s818_s3, %s537_s25 }
   0xf   : > { %v609_v1 = vld [vmem:[%s709_s20 + $0x40] sm:$0xff]   ;;  %v610_v3 = vld [vmem:[%s709_s20 + $0x48] sm:$0xff]   ;;  %v611_v24 = vld [vmem:[%s709_s20 + $0x50] sm:$0xff]  }
  0x10   : > { %v539_v2 = vld [vmem:[%s709_s20] sm:$0xff]   ;;  %v572_v4 = vunpack.c.l.bf16 %v609_v1  ;;  %v573_v6 = vunpack.c.h.bf16 %v609_v1  ;;  %v602_v8 = vld [vmem:[%s709_s20 + $0x8] sm:$0xff]   ;;  %v576_v10 = vunpack.c.l.bf16 %v610_v3  ;;  %v577_v18 = vunpack.c.h.bf16 %v610_v3  ;;  %v603_v25 = vld [vmem:[%s709_s20 + $0x10] sm:$0xff]  }
  0x11   : > { %v540_v5 = vunpack.c.l.bf16 %v539_v2  ;;  %v541_v7 = vunpack.c.h.bf16 %v539_v2  ;;  %v544_v11 = vunpack.c.l.bf16 %v602_v8  ;;  %v545_v19 = vunpack.c.h.bf16 %v602_v8  ;;  %v612_v44 = vld [vmem:[%s709_s20 + $0x58] sm:$0xff]   ;;  %v613_v62 = vld [vmem:[%s709_s20 + $0x60] sm:$0xff]  }
  0x12   : > { %v290_v12 = vmul.f32 %v572_v4, %v714_v0  ;;  %v291_v14 = vmul.f32 %v573_v6, %v714_v0  ;;  %v292_v16 = vmul.f32 %v576_v10, %v714_v0  ;;  %v293_v30 = vmul.f32 %v577_v18, %v714_v0  ;;  %v604_v45 = vld [vmem:[%s709_s20 + $0x18] sm:$0xff]   ;;  %v605_v63 = vld [vmem:[%s709_s20 + $0x20] sm:$0xff]   ;;  %v614_v18 = vld [vmem:[%s709_s20 + $0x68] sm:$0xff]  }
  0x13   : > { %v274_v13 = vmul.f32 %v540_v5, %v714_v0  ;;  %v275_v15 = vmul.f32 %v541_v7, %v714_v0  ;;  %v276_v17 = vmul.f32 %v544_v11, %v714_v0  ;;  %v277_v31 = vmul.f32 %v545_v19, %v714_v0  ;;  %v606_v19 = vld [vmem:[%s709_s20 + $0x28] sm:$0xff]  }
  0x14   : > { %v329_v20 = vadd.f32 %v723_v9, %v290_v12  ;;  %v330_v22 = vadd.f32 %v723_v9, %v291_v14  ;;  %v331_v28 = vadd.f32 %v723_v9, %v292_v16  ;;  %v580_v34 = vunpack.c.l.bf16 %v611_v24 }
  0x15   : > { %v313_v21 = vadd.f32 %v723_v9, %v274_v13  ;;  %v314_v23 = vadd.f32 %v723_v9, %v275_v15  ;;  %v315_v29 = vadd.f32 %v723_v9, %v276_v17  ;;  %v548_v35 = vunpack.c.l.bf16 %v603_v25 }
  0x16   : > { %v361_v26 = vmax.f32 %v329_v20, 0.0  ;;  %v362_v32 = vmax.f32 %v330_v22, 0.0  ;;  %v363_v36 = vmax.f32 %v331_v28, 0.0  ;;  %v332_v37 = vadd.f32 %v723_v9, %v293_v30 }
  0x17   : > { %v345_v27 = vmax.f32 %v313_v21, 0.0  ;;  %v346_v33 = vmax.f32 %v314_v23, 0.0  ;;  %v316_v38 = vadd.f32 %v723_v9, %v277_v31  ;;  %v581_v39 = vunpack.c.h.bf16 %v611_v24 }
  0x18   : > { %409 = vxpose.xlu1.b32.start [1/16] (narrow) %v361_v26, 8  ;;  %v347_v40 = vmax.f32 %v315_v29, 0.0  ;;  %v294_v41 = vmul.f32 %v580_v34, %v714_v0  ;;  %v278_v42 = vmul.f32 %v548_v35, %v714_v0  ;;  %v549_v43 = vunpack.c.h.bf16 %v603_v25 }
  0x19   : > { %377 = vxpose.xlu0.b32.start [1/16] (narrow) %v345_v27, 8  ;;  %v364_v46 = vmax.f32 %v332_v37, 0.0  ;;  %v295_v47 = vmul.f32 %v581_v39, %v714_v0  ;;  %v584_v48 = vunpack.c.l.bf16 %v612_v44  ;;  %v552_v49 = vunpack.c.l.bf16 %v604_v45  ;;  %v607_v37 = vld [vmem:[%s709_s20 + $0x30] sm:$0xff]  }
  0x1a   : > { %v348_v50 = vmax.f32 %v316_v38, 0.0  ;;  %v333_v51 = vadd.f32 %v723_v9, %v294_v41  ;;  %v317_v52 = vadd.f32 %v723_v9, %v278_v42  ;;  %v279_v53 = vmul.f32 %v549_v43, %v714_v0 }
  0x1b   : > { %v296_v54 = vmul.f32 %v584_v48, %v714_v0  ;;  %v280_v55 = vmul.f32 %v552_v49, %v714_v0  ;;  %v585_v56 = vunpack.c.h.bf16 %v612_v44  ;;  %v553_v57 = vunpack.c.h.bf16 %v604_v45 }
  0x1c   : > { %410 = vxpose.xlu1.b32.cont [2/16] (narrow) %v362_v32, 8  ;;  %v365_v58 = vmax.f32 %v333_v51, 0.0  ;;  %v349_v59 = vmax.f32 %v317_v52, 0.0  ;;  %v334_v60 = vadd.f32 %v723_v9, %v295_v47  ;;  %v318_v61 = vadd.f32 %v723_v9, %v279_v53 }
  0x1d   : > { %378 = vxpose.xlu0.b32.cont [2/16] (narrow) %v346_v33, 8  ;;  %v335_v1 = vadd.f32 %v723_v9, %v296_v54  ;;  %v297_v2 = vmul.f32 %v585_v56, %v714_v0  ;;  %v281_v3 = vmul.f32 %v553_v57, %v714_v0  ;;  %v588_v4 = vunpack.c.l.bf16 %v613_v62  ;;  %v616_v54 = vld [vmem:[%s709_s20 + $0x78] sm:$0xff]  }
  0x1e   : > { %v366_v5 = vmax.f32 %v334_v60, 0.0  ;;  %v350_v6 = vmax.f32 %v318_v61, 0.0  ;;  %v319_v7 = vadd.f32 %v723_v9, %v280_v55  ;;  %v556_v8 = vunpack.c.l.bf16 %v605_v63  ;;  %v608_v55 = vld [vmem:[%s709_s20 + $0x38] sm:$0xff]  }
  0x1f   : > { %v367_v10 = vmax.f32 %v335_v1, 0.0  ;;  %v336_v11 = vadd.f32 %v723_v9, %v297_v2  ;;  %v320_v12 = vadd.f32 %v723_v9, %v281_v3  ;;  %v298_v13 = vmul.f32 %v588_v4, %v714_v0 }
  0x20   : > { %411 = vxpose.xlu1.b32.cont [3/16] (narrow) %v363_v36, 8  ;;  %v351_v14 = vmax.f32 %v319_v7, 0.0  ;;  %v282_v15 = vmul.f32 %v556_v8, %v714_v0  ;;  %v589_v16 = vunpack.c.h.bf16 %v613_v62  ;;  %v557_v17 = vunpack.c.h.bf16 %v605_v63  ;;  %v615_v36 = vld [vmem:[%s709_s20 + $0x70] sm:$0xff]  }
  0x21   : > { %379 = vxpose.xlu0.b32.cont [3/16] (narrow) %v347_v40, 8  ;;  %v368_v20 = vmax.f32 %v336_v11, 0.0  ;;  %v337_v21 = vadd.f32 %v723_v9, %v298_v13  ;;  %v592_v22 = vunpack.c.l.bf16 %v614_v18  ;;  %v560_v23 = vunpack.c.l.bf16 %v606_v19 }
  0x22   : > { %v352_v24 = vmax.f32 %v320_v12, 0.0  ;;  %v321_v25 = vadd.f32 %v723_v9, %v282_v15  ;;  %v299_v26 = vmul.f32 %v589_v16, %v714_v0  ;;  %v283_v27 = vmul.f32 %v557_v17, %v714_v0 }
  0x23   : > { %v300_v28 = vmul.f32 %v592_v22, %v714_v0  ;;  %v284_v29 = vmul.f32 %v560_v23, %v714_v0  ;;  %v593_v30 = vunpack.c.h.bf16 %v614_v18  ;;  %v561_v31 = vunpack.c.h.bf16 %v606_v19 }
  0x24   : > { %412 = vxpose.xlu1.b32.cont [4/16] (narrow) %v364_v46, 8  ;;  %v369_v32 = vmax.f32 %v337_v21, 0.0  ;;  %v353_v33 = vmax.f32 %v321_v25, 0.0  ;;  %v338_v34 = vadd.f32 %v723_v9, %v299_v26  ;;  %v322_v35 = vadd.f32 %v723_v9, %v283_v27 }
  0x25   : > { %380 = vxpose.xlu0.b32.cont [4/16] (narrow) %v348_v50, 8  ;;  %v339_v38 = vadd.f32 %v723_v9, %v300_v28  ;;  %v301_v39 = vmul.f32 %v593_v30, %v714_v0  ;;  %v285_v40 = vmul.f32 %v561_v31, %v714_v0  ;;  %v596_v41 = vunpack.c.l.bf16 %v615_v36 }
  0x26   : > { %v370_v42 = vmax.f32 %v338_v34, 0.0  ;;  %v354_v43 = vmax.f32 %v322_v35, 0.0  ;;  %v323_v44 = vadd.f32 %v723_v9, %v284_v29  ;;  %v564_v45 = vunpack.c.l.bf16 %v607_v37 }
  0x27   : > { %v371_v46 = vmax.f32 %v339_v38, 0.0  ;;  %v340_v47 = vadd.f32 %v723_v9, %v301_v39  ;;  %v324_v48 = vadd.f32 %v723_v9, %v285_v40  ;;  %v302_v49 = vmul.f32 %v596_v41, %v714_v0 }
  0x28   : > { %413 = vxpose.xlu1.b32.cont [5/16] (narrow) %v365_v58, 8  ;;  %v355_v50 = vmax.f32 %v323_v44, 0.0  ;;  %v286_v51 = vmul.f32 %v564_v45, %v714_v0  ;;  %v597_v52 = vunpack.c.h.bf16 %v615_v36  ;;  %v565_v53 = vunpack.c.h.bf16 %v607_v37 }
  0x29   : > { %381 = vxpose.xlu0.b32.cont [5/16] (narrow) %v349_v59, 8  ;;  %v372_v56 = vmax.f32 %v340_v47, 0.0  ;;  %v341_v57 = vadd.f32 %v723_v9, %v302_v49  ;;  %v600_v58 = vunpack.c.l.bf16 %v616_v54  ;;  %v568_v59 = vunpack.c.l.bf16 %v608_v55 }
  0x2a   : > { %v356_v60 = vmax.f32 %v324_v48, 0.0  ;;  %v325_v61 = vadd.f32 %v723_v9, %v286_v51  ;;  %v303_v62 = vmul.f32 %v597_v52, %v714_v0  ;;  %v287_v63 = vmul.f32 %v565_v53, %v714_v0 }
  0x2b   : > { %v304_v1 = vmul.f32 %v600_v58, %v714_v0  ;;  %v288_v2 = vmul.f32 %v568_v59, %v714_v0  ;;  %v601_v3 = vunpack.c.h.bf16 %v616_v54  ;;  %v569_v4 = vunpack.c.h.bf16 %v608_v55 }
  0x2c   : > { %414 = vxpose.xlu1.b32.cont [6/16] (narrow) %v366_v5, 8  ;;  %v373_v5 = vmax.f32 %v341_v57, 0.0  ;;  %v342_v7 = vadd.f32 %v723_v9, %v303_v62  ;;  %v326_v8 = vadd.f32 %v723_v9, %v287_v63 }
  0x2d   : > { %382 = vxpose.xlu0.b32.cont [6/16] (narrow) %v350_v6, 8  ;;  %v357_v6 = vmax.f32 %v325_v61, 0.0  ;;  %v289_v11 = vmul.f32 %v569_v4, %v714_v0  ;;  %v327_v15 = vadd.f32 %v723_v9, %v288_v2 }
  0x2e   : > { %v374_v12 = vmax.f32 %v342_v7, 0.0  ;;  %v358_v13 = vmax.f32 %v326_v8, 0.0 }
  0x2f   : > { %v359_v17 = vmax.f32 %v327_v15, 0.0  ;;  %v328_v19 = vadd.f32 %v723_v9, %v289_v11 }
  0x30   : > { %415 = vxpose.xlu1.b32.cont [7/16] (narrow) %v367_v10, 8  ;;  %v305_v10 = vmul.f32 %v601_v3, %v714_v0 }
  0x31   : > { %383 = vxpose.xlu0.b32.cont [7/16] (narrow) %v351_v14, 8  ;;  %v343_v14 = vadd.f32 %v723_v9, %v304_v1 }
  0x32   : > { %v344_v18 = vadd.f32 %v723_v9, %v305_v10 }
  0x33   : > { %v375_v16 = vmax.f32 %v343_v14, 0.0 }
  0x34   : > { %416 = vxpose.xlu1.b32.cont [8/16] (narrow) %v368_v20, 8  ;;  %v376_v0 = vmax.f32 %v344_v18, 0.0  ;;  %v360_v20 = vmax.f32 %v328_v19, 0.0 }
  0x35   : > { %384 = vxpose.xlu0.b32.cont [8/16] (narrow) %v352_v24, 8 }
  0x38   : > { %417 = vxpose.xlu1.b32.cont [9/16] (narrow) %v369_v32, 8 }
  0x39   : > { %385 = vxpose.xlu0.b32.cont [9/16] (narrow) %v353_v33, 8 }
  0x3c   : > { %418 = vxpose.xlu1.b32.cont [10/16] (narrow) %v370_v42, 8 }
  0x3d   : > { %386 = vxpose.xlu0.b32.cont [10/16] (narrow) %v354_v43, 8 }
  0x40   : > { %419 = vxpose.xlu1.b32.cont [11/16] (narrow) %v371_v46, 8 }
  0x41   : > { %387 = vxpose.xlu0.b32.cont [11/16] (narrow) %v355_v50, 8 }
  0x44   : > { %420 = vxpose.xlu1.b32.cont [12/16] (narrow) %v372_v56, 8 }
  0x45   : > { %388 = vxpose.xlu0.b32.cont [12/16] (narrow) %v356_v60, 8 }
  0x48   : > { %421 = vxpose.xlu1.b32.cont [13/16] (narrow) %v373_v5, 8 }
  0x49   : > { %389 = vxpose.xlu0.b32.cont [13/16] (narrow) %v357_v6, 8 }
  0x4c   : > { %422 = vxpose.xlu1.b32.cont [14/16] (narrow) %v374_v12, 8 }
  0x4d   : > { %390 = vxpose.xlu0.b32.cont [14/16] (narrow) %v358_v13, 8 }
  0x50   : > { %423 = vxpose.xlu1.b32.cont [15/16] (narrow) %v375_v16, 8 }
  0x51   : > { %391 = vxpose.xlu0.b32.cont [15/16] (narrow) %v359_v17, 8 }
  0x54   : > { %424 = vxpose.xlu1.b32.end [16/16] (narrow) %v376_v0, 8 }
  0x55   : > { %392 = vxpose.xlu0.b32.end [16/16] (narrow) %v360_v20, 8 }
  0x94   : > { %v425_v21 = vpop.trf.xlu1 }
  0x95   : > { %v393_v22 = vpop.trf.xlu0  ;;  %442 = vst [vmem:[%s201_s28 + $0x8] sm:$0xff] %v425_v21 }
  0x96   : > { %441 = vst [vmem:[%s201_s28] sm:$0xff] %v393_v22 }
  0x97 PF: > { %s13_s14 = sadd.s32 1, %s663_s14   ;;  %s819_s12 = smov %s659_s13 }
  0x98   : > { %p10_p6 = scmp.ge.s32.totalorder %s13_s14, 4   ;;  %s820_s13 = smov %s822_s15 }
  0x9a   :  { %12 = sbr.rel (!%p10_p6) target bundleno = 2 (0x2), region = 62 }

// kernel: basic_conv_forward.2
= control target key start
LH: loop header
LB: loop body
LE: loop exit
PB: predicated region body
PF: predicated region fallthrough
CT: control target
= control target key end

     0   :  { %s1560_s12 = smov 0   ;;  %s1562_s13 = smov 0   ;;  %s1758_s0 = inlined_call_operand.vmem [shape: bf16[512,128], index: 0, kind: input, shape index: {}]   ;;  %s1759_s1 = inlined_call_operand.vmem [shape: bf16[128,128], index: 1, kind: input, shape index: {}]   ;;  %s1760_s2 = inlined_call_operand.vmem [shape: bf16[512,128], index: 2, kind: output, shape index: {0}]   ;;  %s1761_s3 = inlined_call_operand.vmem [shape: f32[2,2,128], index: 3, kind: output, shape index: {1}]  }
   0x1   :  { %s1564_s14 = smov 0  }
   0x2 LB: > { %s33_s15 = sadd.s32 1, %s1534_s13  ;;  %p1189_p0 = scmp.ge.s32.totalorder %s1538_s14, 1  ;;  %s1538_s14 = sphi %s1564_s14, %s14_s14   ;;  %s1534_s13 = sphi %s1562_s13, %s1763_s13   ;;  %s1530_s12 = sphi %s1560_s12, %s1762_s12  }
   0x3   : > { %p35_p1 = scmp.ge.s32.totalorder %s33_s15, 2  ;;  %p178_p2 = scmp.lt.s32.totalorder %s1538_s14, 3 }
   0x5   : > { %s1765_s15 = smov (%p35_p1, %s33_s15), 0  ;;  %p179_p3 = pnand %p1189_p0, %p178_p2 }
   0x6   : > { %s1190_s18 = sshll.u32 (!%p179_p3), %s1530_s12, 5  ;;  %p241_p5 = scmp.lt.s32.totalorder (!%p179_p3), %s1530_s12, 1 }
   0x7   : > { %182 = sbr.rel (%p179_p3) target bundleno = 322 (0x142), region = 28  ;;  %p220_p4 = scmp.lt.s32.totalorder (!%p179_p3), %s1190_s18, 63 }
   0xc   : > { %v1492_v0 = vld [vmem:[%s1759_s1 + $0x38] sm:$0xff]   ;;  %v1493_v1 = vld [vmem:[%s1759_s1 + $0x30] sm:$0xff]   ;;  %s1767_s18 = smov (!%p220_p4, %s1190_s18), 63  ;;  %v1494_v2 = vld [vmem:[%s1759_s1 + $0x28] sm:$0xff]   ;;  %s1769_s12 = smov (!%p241_p5, %s1530_s12), 1 }
   0xd   : > { %1404 = vmatprep.subr.bf16.mxu0 %v1492_v0  ;;  %1452 = vmatprep.subr.bf16.mxu1 %v1492_v0  ;;  %s1191_s23 = sshll.u32 %s1767_s18, 2  ;;  %v1495_v3 = vld [vmem:[%s1759_s1 + $0x20] sm:$0xff]   ;;  %v1496_v5 = vld [vmem:[%s1759_s1 + $0x18] sm:$0xff]   ;;  %v1497_v6 = vld [vmem:[%s1759_s1 + $0x10] sm:$0xff]   ;;  %s1194_s17 = sshll.u32 %s1769_s12, 1 }
   0xe   : > { %1405 = vmatpush3.bf16.msra.mxu0 %v1492_v0  ;;  %1460 = vmatpush3.bf16.msra.mxu1 %v1492_v0  ;;  %s1598_s26 = scalar_lea.vmem %s1758_s0, %s1191_s23  ;;  %v1498_v8 = vld [vmem:[%s1759_s1 + $0x8] sm:$0xff]   ;;  %v1499_v9 = vld [vmem:[%s1759_s1] sm:$0xff]   ;;  %s1640_s16 = scalar_lea.vmem %s1760_s2, %s1191_s23 }
   0xf   : > { %1406 = vmatprep.subr.bf16.mxu0 %v1493_v1  ;;  %1453 = vmatprep.subr.bf16.mxu1 %v1493_v1  ;;  %v1500_v4 = vld [vmem:[%s1598_s26] sm:$0xff]   ;;  %v1501_v10 = vld [vmem:[%s1598_s26 + $0x8] sm:$0xff]   ;;  %v1502_v12 = vld [vmem:[%s1598_s26 + $0x10] sm:$0xff]   ;;  %s247_s20 = scalar_lea.vmem %s1761_s3, %s1194_s17 }
  0x10   : > { %1420 = vmatprep.mubr.bf16.mxu0 %v1500_v4  ;;  %v1508_v7 = vld [vmem:[%s1598_s26 + $0x40] sm:$0xff]   ;;  %v1509_v11 = vld [vmem:[%s1598_s26 + $0x48] sm:$0xff]   ;;  %v1510_v13 = vld [vmem:[%s1598_s26 + $0x50] sm:$0xff]  }
  0x11   : > { %1436 = vmatprep.mubr.bf16.mxu1 %v1508_v7  ;;  %v1503_v14 = vld [vmem:[%s1598_s26 + $0x18] sm:$0xff]   ;;  %v1504_v16 = vld [vmem:[%s1598_s26 + $0x20] sm:$0xff]   ;;  %v1505_v18 = vld [vmem:[%s1598_s26 + $0x28] sm:$0xff]  }
  0x12   : > { %1407 = vmatpush3.bf16.msra.mxu0 %v1493_v1  ;;  %1461 = vmatpush3.bf16.msra.mxu1 %v1493_v1  ;;  %v1511_v15 = vld [vmem:[%s1598_s26 + $0x58] sm:$0xff]   ;;  %v1512_v17 = vld [vmem:[%s1598_s26 + $0x60] sm:$0xff]   ;;  %v1513_v19 = vld [vmem:[%s1598_s26 + $0x68] sm:$0xff]  }
  0x13   : > { %1408 = vmatprep.subr.bf16.mxu0 %v1494_v2  ;;  %1454 = vmatprep.subr.bf16.mxu1 %v1494_v2  ;;  %v1506_v20 = vld [vmem:[%s1598_s26 + $0x30] sm:$0xff]   ;;  %v1507_v22 = vld [vmem:[%s1598_s26 + $0x38] sm:$0xff]  }
  0x14   : > { %v1514_v21 = vld [vmem:[%s1598_s26 + $0x70] sm:$0xff]   ;;  %v1515_v23 = vld [vmem:[%s1598_s26 + $0x78] sm:$0xff]  }
  0x16   : > { %1409 = vmatpush3.bf16.msra.mxu0 %v1494_v2  ;;  %1462 = vmatpush3.bf16.msra.mxu1 %v1494_v2 }
  0x17   : > { %1410 = vmatprep.subr.bf16.mxu0 %v1495_v3  ;;  %1455 = vmatprep.subr.bf16.mxu1 %v1495_v3 }
  0x1a   : > { %1411 = vmatpush3.bf16.msra.mxu0 %v1495_v3  ;;  %1463 = vmatpush3.bf16.msra.mxu1 %v1495_v3 }
  0x1b   : > { %1412 = vmatprep.subr.bf16.mxu0 %v1496_v5  ;;  %1456 = vmatprep.subr.bf16.mxu1 %v1496_v5 }
  0x1e   : > { %1413 = vmatpush3.bf16.msra.mxu0 %v1496_v5  ;;  %1464 = vmatpush3.bf16.msra.mxu1 %v1496_v5 }
  0x1f   : > { %1414 = vmatprep.subr.bf16.mxu0 %v1497_v6  ;;  %1457 = vmatprep.subr.bf16.mxu1 %v1497_v6 }
  0x22   : > { %1415 = vmatpush3.bf16.msra.mxu0 %v1497_v6  ;;  %1465 = vmatpush3.bf16.msra.mxu1 %v1497_v6 }
  0x23   : > { %1416 = vmatprep.subr.bf16.mxu0 %v1498_v8  ;;  %1458 = vmatprep.subr.bf16.mxu1 %v1498_v8 }
  0x26   : > { %1417 = vmatpush3.bf16.msra.mxu0 %v1498_v8  ;;  %1466 = vmatpush3.bf16.msra.mxu1 %v1498_v8 }
  0x27   : > { %1418 = vmatprep.subr.bf16.mxu0 %v1499_v9  ;;  %1459 = vmatprep.subr.bf16.mxu1 %v1499_v9 }
  0x2a   : > { %1419 = vmatpush3.bf16.msra.mxu0 %v1499_v9  ;;  %1467 = vmatpush3.bf16.msra.mxu1 %v1499_v9 }
  0x2d   : > { %1421 = vmatmul.mubr.bf16.vlgmr.msra.gmra.mxu0 %v1501_v10  ;;  %1437 = vmatmul.mubr.bf16.vlgmr.msra.gmra.mxu1 %v1509_v11 }
  0x2e   : > { %1424 = vmatprep.mubr.bf16.mxu0 %v1502_v12  ;;  %1440 = vmatprep.mubr.bf16.mxu1 %v1510_v13 }
  0x35   : > { %1425 = vmatmul.mubr.bf16.gmra.mxu0 %v1503_v14  ;;  %1441 = vmatmul.mubr.bf16.gmra.mxu1 %v1511_v15 }
  0x36   : > { %1428 = vmatprep.mubr.bf16.mxu0 %v1504_v16  ;;  %1444 = vmatprep.mubr.bf16.mxu1 %v1512_v17 }
  0x3d   : > { %1429 = vmatmul.mubr.bf16.gmra.mxu0 %v1505_v18  ;;  %1445 = vmatmul.mubr.bf16.gmra.mxu1 %v1513_v19 }
  0x3e   : > { %1432 = vmatprep.mubr.bf16.mxu0 %v1506_v20  ;;  %1448 = vmatprep.mubr.bf16.mxu1 %v1514_v21 }
  0x45   : > { %1433 = vmatmul.mubr.bf16.gmra.mxu0 %v1507_v22  ;;  %1449 = vmatmul.mubr.bf16.gmra.mxu1 %v1515_v23 }
  0xed   : > { %v1422_v24 = vpop.f32.mrf.mxu0  ;;  %v1631_v25 = vpop.f32.mrf.mxu1 }
  0xee   : > { %v973_v41 = vmul.f32 %v1422_v24, %v1422_v24 }
  0xef   : > { %v548_v26 = vpop.f32.mrf.mxu0  ;;  %v1633_v27 = vpop.f32.mrf.mxu1 }
  0xf0   : > { %v971_v32 = vmul.f32 %v548_v26, %v548_v26 }
  0xf1   : > { %v1423_v28 = vpop.f32.mrf.mxu0  ;;  %v1642_v29 = vpop.f32.mrf.mxu1 }
  0xf2   : > { %v1293_v30 = vpack.c.bf16 %v1423_v28, %v1422_v24  ;;  %v1333_v31 = vpack.c.bf16 %v1642_v29, %v1631_v25  ;;  %v974_v46 = vmul.f32 %v1423_v28, %v1423_v28 }
  0xf3   : > { %v551_v33 = vpop.f32.mrf.mxu0  ;;  %v1646_v34 = vpop.f32.mrf.mxu1 }
  0xf4   : > { %1365 = vst [vmem:[%s1640_s16 + $0x8] sm:$0xff] %v1293_v30   ;;  %v1288_v35 = vpack.c.bf16 %v551_v33, %v548_v26  ;;  %v934_v36 = vadd.f32 %v551_v33, %v548_v26  ;;  %v972_v37 = vmul.f32 %v551_v33, %v551_v33  ;;  %1373 = vst [vmem:[%s1640_s16 + $0x48] sm:$0xff] %v1333_v31  }
  0xf5   : > { %v1328_v38 = vpack.c.bf16 %v1646_v34, %v1633_v27  ;;  %v1426_v39 = vpop.f32.mrf.mxu0  ;;  %v1652_v40 = vpop.f32.mrf.mxu1 }
  0xf6   : > { %1289 = vst [vmem:[%s1640_s16] sm:$0xff] %v1288_v35   ;;  %v935_v42 = vadd.f32 %v1422_v24, %v934_v36  ;;  %v1003_v43 = vadd.f32 %v972_v37, %v971_v32  ;;  %v977_v1 = vmul.f32 %v1426_v39, %v1426_v39 }
  0xf7   : > { %1372 = vst [vmem:[%s1640_s16 + $0x40] sm:$0xff] %v1328_v38   ;;  %v564_v44 = vpop.f32.mrf.mxu0  ;;  %v1656_v45 = vpop.f32.mrf.mxu1 }
  0xf8   : > { %v1004_v47 = vadd.f32 %v1003_v43, %v973_v41  ;;  %v936_v48 = vadd.f32 %v1423_v28, %v935_v42  ;;  %v975_v52 = vmul.f32 %v564_v44, %v564_v44 }
  0xf9   : > { %v1427_v49 = vpop.f32.mrf.mxu0  ;;  %v1658_v50 = vpop.f32.mrf.mxu1 }
  0xfa   : > { %v937_v51 = vadd.f32 %v936_v48, %v564_v44  ;;  %v1005_v53 = vadd.f32 %v1004_v47, %v974_v46  ;;  %v1303_v54 = vpack.c.bf16 %v1427_v49, %v1426_v39  ;;  %v1343_v56 = vpack.c.bf16 %v1658_v50, %v1652_v40 }
  0xfb   : > { %v567_v55 = vpop.f32.mrf.mxu0  ;;  %v1662_v57 = vpop.f32.mrf.mxu1  ;;  %v978_v6 = vmul.f32 %v1427_v49, %v1427_v49 }
  0xfc   : > { %v1006_v58 = vadd.f32 %v1005_v53, %v975_v52  ;;  %1367 = vst [vmem:[%s1640_s16 + $0x18] sm:$0xff] %v1303_v54   ;;  %v1298_v59 = vpack.c.bf16 %v567_v55, %v564_v44  ;;  %v938_v60 = vadd.f32 %v937_v51, %v567_v55  ;;  %v976_v61 = vmul.f32 %v567_v55, %v567_v55 }
  0xfd   : > { %v1430_v62 = vpop.f32.mrf.mxu0  ;;  %1375 = vst [vmem:[%s1640_s16 + $0x58] sm:$0xff] %v1343_v56   ;;  %v1338_v63 = vpack.c.bf16 %v1662_v57, %v1656_v45  ;;  %v1668_v0 = vpop.f32.mrf.mxu1 }
  0xfe   : > { %1366 = vst [vmem:[%s1640_s16 + $0x10] sm:$0xff] %v1298_v59   ;;  %v939_v2 = vadd.f32 %v1426_v39, %v938_v60  ;;  %v1007_v3 = vadd.f32 %v1006_v58, %v976_v61  ;;  %v981_v26 = vmul.f32 %v1430_v62, %v1430_v62  ;;  %v987_v61 = vmul.f32 %v1633_v27, %v1633_v27 }
  0xff   : > { %v580_v4 = vpop.f32.mrf.mxu0  ;;  %1374 = vst [vmem:[%s1640_s16 + $0x50] sm:$0xff] %v1338_v63   ;;  %v1672_v5 = vpop.f32.mrf.mxu1 }
 0x100   : > { %v1008_v7 = vadd.f32 %v1007_v3, %v977_v1  ;;  %v940_v8 = vadd.f32 %v1427_v49, %v939_v2  ;;  %v979_v12 = vmul.f32 %v580_v4, %v580_v4  ;;  %v988_v2 = vmul.f32 %v1646_v34, %v1646_v34 }
 0x101   : > { %v1431_v9 = vpop.f32.mrf.mxu0  ;;  %v1674_v10 = vpop.f32.mrf.mxu1 }
 0x102   : > { %v941_v11 = vadd.f32 %v940_v8, %v580_v4  ;;  %v1009_v13 = vadd.f32 %v1008_v7, %v978_v6  ;;  %v1313_v14 = vpack.c.bf16 %v1431_v9, %v1430_v62  ;;  %v1353_v16 = vpack.c.bf16 %v1674_v10, %v1668_v0 }
 0x103   : > { %v583_v15 = vpop.f32.mrf.mxu0  ;;  %v1678_v17 = vpop.f32.mrf.mxu1  ;;  %v982_v33 = vmul.f32 %v1431_v9, %v1431_v9  ;;  %v990_v8 = vmul.f32 %v1642_v29, %v1642_v29 }
 0x104   : > { %v1010_v18 = vadd.f32 %v1009_v13, %v979_v12  ;;  %1369 = vst [vmem:[%s1640_s16 + $0x28] sm:$0xff] %v1313_v14   ;;  %v1308_v19 = vpack.c.bf16 %v583_v15, %v580_v4  ;;  %v942_v20 = vadd.f32 %v941_v11, %v583_v15  ;;  %v980_v21 = vmul.f32 %v583_v15, %v583_v15 }
 0x105   : > { %v1434_v22 = vpop.f32.mrf.mxu0  ;;  %1377 = vst [vmem:[%s1640_s16 + $0x68] sm:$0xff] %v1353_v16   ;;  %v1348_v23 = vpack.c.bf16 %v1678_v17, %v1672_v5  ;;  %v1684_v24 = vpop.f32.mrf.mxu1  ;;  %v989_v4 = vmul.f32 %v1631_v25, %v1631_v25  ;;  %v991_v12 = vmul.f32 %v1656_v45, %v1656_v45  ;;  %v992_v15 = vmul.f32 %v1662_v57, %v1662_v57 }
 0x106   : > { %1368 = vst [vmem:[%s1640_s16 + $0x20] sm:$0xff] %v1308_v19   ;;  %v943_v28 = vadd.f32 %v1430_v62, %v942_v20  ;;  %v1011_v30 = vadd.f32 %v1010_v18, %v980_v21  ;;  %v985_v54 = vmul.f32 %v1434_v22, %v1434_v22  ;;  %v995_v21 = vmul.f32 %v1672_v5, %v1672_v5 }
 0x107   : > { %v596_v31 = vpop.f32.mrf.mxu0  ;;  %1376 = vst [vmem:[%s1640_s16 + $0x60] sm:$0xff] %v1348_v23   ;;  %v1688_v32 = vpop.f32.mrf.mxu1 }
 0x108   : > { %v1012_v35 = vadd.f32 %v1011_v30, %v981_v26  ;;  %v944_v36 = vadd.f32 %v1431_v9, %v943_v28  ;;  %v983_v41 = vmul.f32 %v596_v31, %v596_v31  ;;  %v996_v26 = vmul.f32 %v1678_v17, %v1678_v17 }
 0x109   : > { %v1435_v37 = vpop.f32.mrf.mxu0  ;;  %v1690_v38 = vpop.f32.mrf.mxu1 }
 0x10a   : > { %v945_v39 = vadd.f32 %v944_v36, %v596_v31  ;;  %v1013_v42 = vadd.f32 %v1012_v35, %v982_v33  ;;  %v1323_v43 = vpack.c.bf16 %v1435_v37, %v1434_v22  ;;  %v1363_v46 = vpack.c.bf16 %v1690_v38, %v1684_v24 }
 0x10b   : > { %v599_v44 = vpop.f32.mrf.mxu0  ;;  %v663_v47 = vpop.f32.mrf.mxu1  ;;  %v986_v58 = vmul.f32 %v1435_v37, %v1435_v37  ;;  %v999_v35 = vmul.f32 %v1688_v32, %v1688_v32 }
 0x10c   : > { %v1014_v48 = vadd.f32 %v1013_v42, %v983_v41  ;;  %1371 = vst [vmem:[%s1640_s16 + $0x38] sm:$0xff] %v1323_v43   ;;  %v1318_v49 = vpack.c.bf16 %v599_v44, %v596_v31  ;;  %v946_v51 = vadd.f32 %v945_v39, %v599_v44  ;;  %v984_v52 = vmul.f32 %v599_v44, %v599_v44 }
 0x10d   : > { %1379 = vst [vmem:[%s1640_s16 + $0x78] sm:$0xff] %v1363_v46   ;;  %v1358_v53 = vpack.c.bf16 %v663_v47, %v1688_v32  ;;  %v1000_v39 = vmul.f32 %v663_v47, %v663_v47  ;;  %v1002_v43 = vmul.f32 %v1690_v38, %v1690_v38 }
 0x10e   : > { %1370 = vst [vmem:[%s1640_s16 + $0x30] sm:$0xff] %v1318_v49   ;;  %v947_v55 = vadd.f32 %v1434_v22, %v946_v51  ;;  %v1015_v56 = vadd.f32 %v1014_v48, %v984_v52  ;;  %v1040_v51 = vlaneseq }
 0x10f   : > { %1378 = vst [vmem:[%s1640_s16 + $0x70] sm:$0xff] %v1358_v53  }
 0x110   : > { %v948_v59 = vadd.f32 %v1435_v37, %v947_v55  ;;  %v1016_v60 = vadd.f32 %v1015_v56, %v985_v54  ;;  %v1041_v55 = vshrl.u32 %v1040_v51, 7 }
 0x112   : > { %v1017_v62 = vadd.f32 %v1016_v60, %v986_v58  ;;  %v949_v63 = vadd.f32 %v948_v59, %v1633_v27  ;;  %vm1042_vm0 = vcmp.eq.s32.totalorder %v1041_v55, 0 }
 0x114   : > { %v950_v1 = vadd.f32 %v949_v63, %v1646_v34  ;;  %v1018_v3 = vadd.f32 %v1017_v62, %v987_v61 }
 0x116   : > { %v951_v6 = vadd.f32 %v1631_v25, %v950_v1  ;;  %v1019_v7 = vadd.f32 %v1018_v3, %v988_v2  ;;  %v993_v25 = vmul.f32 %v1652_v40, %v1652_v40 }
 0x118   : > { %v1020_v9 = vadd.f32 %v1019_v7, %v989_v4  ;;  %v952_v11 = vadd.f32 %v1642_v29, %v951_v6  ;;  %v994_v29 = vmul.f32 %v1658_v50, %v1658_v50 }
 0x11a   : > { %v953_v27 = vadd.f32 %v952_v11, %v1656_v45  ;;  %v1021_v13 = vadd.f32 %v1020_v9, %v990_v8 }
 0x11c   : > { %v1022_v34 = vadd.f32 %v1021_v13, %v991_v12  ;;  %v954_v14 = vadd.f32 %v953_v27, %v1662_v57 }
 0x11e   : > { %v955_v16 = vadd.f32 %v1652_v40, %v954_v14  ;;  %v1023_v18 = vadd.f32 %v1022_v34, %v992_v15  ;;  %v997_v40 = vmul.f32 %v1668_v0, %v1668_v0 }
 0x120   : > { %v1024_v19 = vadd.f32 %v1023_v18, %v993_v25  ;;  %v956_v20 = vadd.f32 %v1658_v50, %v955_v16  ;;  %v998_v50 = vmul.f32 %v1674_v10, %v1674_v10 }
 0x122   : > { %v957_v45 = vadd.f32 %v956_v20, %v1672_v5  ;;  %v1025_v22 = vadd.f32 %v1024_v19, %v994_v29 }
 0x124   : > { %v1026_v23 = vadd.f32 %v1025_v22, %v995_v21  ;;  %v958_v57 = vadd.f32 %v957_v45, %v1678_v17 }
 0x126   : > { %v959_v28 = vadd.f32 %v1668_v0, %v958_v57  ;;  %v1027_v30 = vadd.f32 %v1026_v23, %v996_v26  ;;  %v1001_v0 = vmul.f32 %v1684_v24, %v1684_v24 }
 0x128   : > { %v1028_v31 = vadd.f32 %v1027_v30, %v997_v40  ;;  %v960_v5 = vadd.f32 %v1674_v10, %v959_v28 }
 0x12a   : > { %v961_v33 = vadd.f32 %v960_v5, %v1688_v32  ;;  %v1029_v36 = vadd.f32 %v1028_v31, %v998_v50 }
 0x12c   : > { %v1030_v17 = vadd.f32 %v1029_v36, %v999_v35  ;;  %v962_v37 = vadd.f32 %v961_v33, %v663_v47 }
 0x12e   : > { %v963_v41 = vadd.f32 %v1684_v24, %v962_v37  ;;  %v1031_v42 = vadd.f32 %v1030_v17, %v1000_v39 }
 0x130   : > { %v964_v10 = vadd.f32 %v1690_v38, %v963_v41  ;;  %v1032_v44 = vadd.f32 %v1031_v42, %v1001_v0 }
 0x132   : > { %v965_v46 = vrot.slane %v964_v10, 4  ;;  %v1033_v48 = vadd.f32 %v1032_v44, %v1002_v43 }
 0x134   : > { %v966_v32 = vadd.f32 %v965_v46, %v964_v10  ;;  %v1034_v49 = vrot.slane %v1033_v48, 4 }
 0x136   : > { %v967_v52 = vrot.slane %v966_v32, 2  ;;  %v1035_v47 = vadd.f32 %v1034_v49, %v1033_v48 }
 0x138   : > { %v968_v53 = vadd.f32 %v967_v52, %v966_v32  ;;  %v1036_v54 = vrot.slane %v1035_v47, 2 }
 0x13a   : > { %v969_v24 = vrot.slane %v968_v53, 1  ;;  %v1037_v56 = vadd.f32 %v1036_v54, %v1035_v47 }
 0x13c   : > { %v1038_v58 = vrot.slane %v1037_v56, 1  ;;  %v970_v38 = vadd.f32 %v969_v24, %v968_v53 }
 0x13e   : > { %v1039_v59 = vadd.f32 %v1038_v58, %v1037_v56 }
 0x140   : > { %v1043_v60 = vsel %vm1042_vm0, %v970_v38, %v1039_v59 }
 0x141   : > { %1044 = vst [vmem:[%s247_s20] sm:$0x3] %v1043_v60 }
 0x142 PF: > { %s14_s14 = sadd.s32 1, %s1538_s14   ;;  %s1762_s12 = smov %s1534_s13 }
 0x143   : > { %p11_p6 = scmp.ge.s32.totalorder %s14_s14, 4   ;;  %s1763_s13 = smov %s1765_s15 }
 0x145   :  { %13 = sbr.rel (!%p11_p6) target bundleno = 2 (0x2), region = 82 }

</bundles_post_ra>
